<compile_context>
chip_gen: v7x
topology: tpu7x:2x2x1
jax: 0.10.0
libtpu: 0.0.40
codegen_flags: <defaults>
</compile_context>

<pallas_src>
import functools

import jax
import jax.numpy as jnp
from jax.experimental import pallas as pl
from jax.experimental.pallas import tpu as pltpu


def _round_up(x, m):
    return ((x + m - 1) // m) * m


def _apply_act(v, activation):
    if activation == "relu":
        return jnp.maximum(v, 0.0)
    if activation == "tanh":
        return jnp.tanh(v)
    return v


def _fc_single_k_kernel(x_ref, w_ref, b_ref, o_ref, *, activation, order):
    # Whole K slab in VMEM: no accumulator round-trip, direct store of the result.
    x = x_ref[...]
    if order == ("act", "fc") and activation is not None:
        x = _apply_act(x.astype(jnp.float32), activation).astype(x.dtype)
    out = jnp.dot(x, w_ref[...], preferred_element_type=jnp.float32) + b_ref[...]
    if order == ("fc", "act") and activation is not None:
        out = _apply_act(out, activation)
    o_ref[...] = out.astype(o_ref.dtype)


def _fc_multi_k_kernel(x_ref, w_ref, b_ref, o_ref, acc_ref, *, activation, order):
    # K-innermost ('arbitrary') accumulator pattern with f32 VMEM scratch.
    k = pl.program_id(2)

    @pl.when(k == 0)
    def _():
        acc_ref[...] = jnp.zeros_like(acc_ref)

    x = x_ref[...]
    if order == ("act", "fc") and activation is not None:
        x = _apply_act(x.astype(jnp.float32), activation).astype(x.dtype)
    acc_ref[...] += jnp.dot(x, w_ref[...], preferred_element_type=jnp.float32)

    @pl.when(k == pl.num_programs(2) - 1)
    def _():
        out = acc_ref[...] + b_ref[...]
        if order == ("fc", "act") and activation is not None:
            out = _apply_act(out, activation)
        o_ref[...] = out.astype(o_ref.dtype)


def fc_module_forward(x, weight, bias=None, *, activation="relu",
                      order=("fc", "act"),
                      compute_dtype=jnp.bfloat16,
                      tile_m=None, tile_n=None, tile_k=None,
                      vmem_budget_bytes=40 * 1024 * 1024):
    """x: [..., C_in]; weight: [C_in, C_out]; bias: [C_out] or None -> [..., C_out]."""
    # TODO(synk): nn.Dropout (train-mode RNG masking) not implemented; dropout=None here.
    if activation is not None and activation not in ("relu", "tanh"):
        raise ValueError(f"{activation} is currently not supported.")

    orig_shape = x.shape
    C_in = orig_shape[-1]
    C_out = weight.shape[1]
    M = 1
    for d in orig_shape[:-1]:
        M *= d
    out_dtype = x.dtype
    out_isz = jnp.dtype(out_dtype).itemsize

    cdt = jnp.dtype(compute_dtype) if compute_dtype is not None else jnp.dtype(x.dtype)
    if x.dtype != cdt:
        x = x.astype(cdt)
    if weight.dtype != cdt:
        weight = weight.astype(cdt)
    in_isz = cdt.itemsize

    # Sublane granularity: 8 rows for 32-bit dtypes, 16 for 16-bit packed dtypes.
    row_mult = 16 if in_isz == 2 else 8

    Mg = _round_up(M, row_mult)          # minimal-granularity padded dims
    Kg = _round_up(C_in, 128)
    Ng = _round_up(C_out, 128)

    def fp_bytes(tm_, tn_, tk_, single_k_):
        # Double-buffered x/w/bias/out tiles (+ f32 accumulator when multi-K).
        f = 2 * tm_ * tk_ * in_isz
        f += 2 * tk_ * tn_ * in_isz
        f += 2 * tn_ * 4
        f += 2 * tm_ * tn_ * out_isz
        if not single_k_:
            f += tm_ * tn_ * 4
        return f

    # --- tile selection (clamped to the problem, aligned to (row_mult, 128)) ---
    tm = min(_round_up(min(tile_m if tile_m is not None else 1024, Mg), row_mult), Mg)
    tn = min(_round_up(min(tile_n if tile_n is not None else 1024, Ng), 128), Ng)

    if tile_k is not None:
        tk = min(_round_up(min(tile_k, Kg), 128), Kg)
    else:
        # Prefer one K pass (no accumulator; x tile reused across the N axis).
        tk = Kg if fp_bytes(tm, tn, Kg, True) <= vmem_budget_bytes else min(512, Kg)
    single_k = (tk == Kg)

    # Shrink tm/tn if the footprint would blow the budget (e.g. exotic user tiles).
    while fp_bytes(tm, tn, tk, single_k) > vmem_budget_bytes and (tm > row_mult or tn > 128):
        if tm >= tn and tm > row_mult:
            tm = min(_round_up(max(row_mult, tm // 2), row_mult), Mg)
        elif tn > 128:
            tn = min(_round_up(max(128, tn // 2), 128), Ng)
        else:
            break

    M_pad = _round_up(M, tm)
    N_pad = _round_up(C_out, tn)
    K_pad = _round_up(C_in, tk)

    # --- pad only when actually needed (padding ops are extra HBM passes) ---
    x2d = x.reshape(M, C_in)
    if M_pad != M or K_pad != C_in:
        x2d = jnp.pad(x2d, ((0, M_pad - M), (0, K_pad - C_in)))
    w2d = weight
    if K_pad != C_in or N_pad != C_out:
        w2d = jnp.pad(weight, ((0, K_pad - C_in), (0, N_pad - C_out)))
    if bias is None:
        b2d = jnp.zeros((1, N_pad), jnp.float32)
    else:
        b2d = bias.astype(jnp.float32).reshape(1, C_out)
        if N_pad != C_out:
            b2d = jnp.pad(b2d, ((0, 0), (0, N_pad - C_out)))

    grid_m, grid_n, grid_k = M_pad // tm, N_pad // tn, K_pad // tk

    vmem_limit = int(min(max(fp_bytes(tm, tn, tk, single_k) + (8 << 20), 32 << 20), 96 << 20))

    x_reads = 1 if single_k else grid_n      # single-K path reuses x across the N axis
    cost = pl.CostEstimate(
        flops=2 * M_pad * K_pad * N_pad,
        transcendentals=(M_pad * N_pad if activation == "tanh" else 0),
        bytes_accessed=int(M_pad * K_pad * in_isz * x_reads
                           + K_pad * N_pad * in_isz * grid_m
                           + N_pad * 4
                           + M_pad * N_pad * out_isz),
    )

    if single_k:
        out2d = pl.pallas_call(
            functools.partial(_fc_single_k_kernel, activation=activation, order=order),
            out_shape=jax.ShapeDtypeStruct((M_pad, N_pad), out_dtype),
            grid_spec=pltpu.PrefetchScalarGridSpec(
                num_scalar_prefetch=0,
                grid=(grid_m, grid_n),
                in_specs=[
                    pl.BlockSpec((tm, K_pad), lambda i, j: (i, 0)),   # x row slab (reused over j)
                    pl.BlockSpec((K_pad, tn), lambda i, j: (0, j)),   # weight N slab
                    pl.BlockSpec((1, tn), lambda i, j: (0, j)),       # bias N tile
                ],
                out_specs=pl.BlockSpec((tm, tn), lambda i, j: (i, j)),
            ),
            compiler_params=pltpu.CompilerParams(
                dimension_semantics=("parallel", "parallel"),
                vmem_limit_bytes=vmem_limit,
            ),
            cost_estimate=cost,
        )(x2d, w2d, b2d)
    else:
        out2d = pl.pallas_call(
            functools.partial(_fc_multi_k_kernel, activation=activation, order=order),
            out_shape=jax.ShapeDtypeStruct((M_pad, N_pad), out_dtype),
            grid_spec=pltpu.PrefetchScalarGridSpec(
                num_scalar_prefetch=0,
                grid=(grid_m, grid_n, grid_k),
                in_specs=[
                    pl.BlockSpec((tm, tk), lambda i, j, k: (i, k)),   # x M/K tile
                    pl.BlockSpec((tk, tn), lambda i, j, k: (k, j)),   # weight K/N tile
                    pl.BlockSpec((1, tn), lambda i, j, k: (0, j)),    # bias N tile
                ],
                out_specs=pl.BlockSpec((tm, tn), lambda i, j, k: (i, j)),
                scratch_shapes=[pltpu.VMEM((tm, tn), jnp.float32)],
            ),
            compiler_params=pltpu.CompilerParams(
                dimension_semantics=("parallel", "parallel", "arbitrary"),
                vmem_limit_bytes=vmem_limit,
            ),
            cost_estimate=cost,
        )(x2d, w2d, b2d)

    if M_pad != M or N_pad != C_out:
        out2d = out2d[:M, :C_out]
    return out2d.reshape(orig_shape[:-1] + (C_out,))


def reference_forward(x, weight, bias=None, activation="relu",
                      order=("fc", "act"), compute_dtype=jnp.bfloat16):
    """Pure-JAX reference mirroring the kernel's compute-dtype casts."""
    cdt = jnp.dtype(compute_dtype) if compute_dtype is not None else jnp.dtype(x.dtype)
    xc = x.astype(cdt)
    wc = weight.astype(cdt)
    if order == ("act", "fc") and activation is not None:
        xc = _apply_act(xc.astype(jnp.float32), activation).astype(cdt)
    M = 1
    for d in x.shape[:-1]:
        M *= d
    y = jnp.dot(xc.reshape(M, x.shape[-1]), wc, preferred_element_type=jnp.float32)
    if bias is not None:
        y = y + bias.astype(jnp.float32)
    if order == ("fc", "act") and activation is not None:
        y = _apply_act(y, activation)
    return y.astype(x.dtype).reshape(x.shape[:-1] + (weight.shape[1],))


if __name__ == "__main__":
    key = jax.random.PRNGKey(0)

    def mk(key, B, S, C_in, C_out):
        kx, kw, kb, key = jax.random.split(key, 4)
        x = jax.random.normal(kx, (B, S, C_in), dtype=jnp.float32)
        w = jax.random.normal(kw, (C_in, C_out), dtype=jnp.float32) * 0.1
        b = jax.random.normal(kb, (C_out,), dtype=jnp.float32) * 0.1
        return key, x, w, b

    # Case 1: module-config-like shapes, default bf16 compute, relu, single-K fast path.
    key, x, w, b = mk(key, 2, 8, 32, 64)
    out = fc_module_forward(x, w, b, activation="relu")
    jax.block_until_ready(out)
    assert out.shape == (2, 8, 64)
    ref = reference_forward(x, w, b, activation="relu")
    assert jnp.allclose(out, ref, atol=2e-3, rtol=2e-3)

    # Case 2: ragged (non-aligned) dims exercising the padding + output-slice path.
    key, x, w, b = mk(key, 3, 5, 20, 33)
    out = fc_module_forward(x, w, b, activation="relu")
    jax.block_until_ready(out)
    assert out.shape == (3, 5, 33)
    ref = reference_forward(x, w, b, activation="relu")
    assert jnp.allclose(out, ref, atol=2e-3, rtol=2e-3)

    # Case 3: forced small tiles -> 3-D grid, multi-K accumulator path (bf16 compute).
    key, x, w, b = mk(key, 2, 8, 256, 256)
    w = w * 0.5
    out = fc_module_forward(x, w, b, activation="relu",
                            tile_m=16, tile_n=128, tile_k=128)
    jax.block_until_ready(out)
    assert out.shape == (2, 8, 256)
    ref = reference_forward(x, w, b, activation="relu")
    assert jnp.allclose(out, ref, atol=2e-3, rtol=2e-3)

    # Case 4: exact fp32 path with tanh activation.
    key, x, w, b = mk(key, 2, 8, 32, 48)
    out = fc_module_forward(x, w, b, activation="tanh", compute_dtype=None)
    jax.block_until_ready(out)
    ref = reference_forward(x, w, b, activation="tanh", compute_dtype=None)
    assert jnp.allclose(out, ref, atol=1e-4, rtol=1e-4)

    # Case 5: order=('act','fc') with relu, bf16 compute, no bias.
    key, x, w, b = mk(key, 2, 8, 40, 24)
    out = fc_module_forward(x, w, None, activation="relu", order=("act", "fc"))
    jax.block_until_ready(out)
    ref = reference_forward(x, w, None, activation="relu", order=("act", "fc"))
    assert jnp.allclose(out, ref, atol=2e-3, rtol=2e-3)

    print("KERNEL_OK")
</pallas_src>

<mosaic_0001>
module attributes {stable_mosaic.version = 11 : i64} {
  func.func @_fc_single_k_kernel(%arg0: i32, %arg1: i32, %arg2: memref<16x128xbf16, #tpu.memory_space<vmem>>, %arg3: memref<128x128xbf16, #tpu.memory_space<vmem>>, %arg4: memref<1x128xf32, #tpu.memory_space<vmem>>, %arg5: memref<16x128xf32, #tpu.memory_space<vmem>>) attributes {dimension_semantics = [#tpu.dimension_semantics<parallel>, #tpu.dimension_semantics<parallel>], iteration_bounds = array<i64: 1, 1>, scalar_prefetch = 0 : i64, scratch_operands = 0 : i64, tpu.core_type = #tpu.core_type<tc>, window_params = [{transform_indices = @transform_0, window_bounds = array<i64: 16, 128>}, {transform_indices = @transform_1, window_bounds = array<i64: 128, 128>}, {transform_indices = @transform_2, window_bounds = array<i64: 1, 128>}, {transform_indices = @transform_3, window_bounds = array<i64: 16, 128>}]} {
    %c0 = arith.constant 0 : index
    %c0_0 = arith.constant 0 : index
    %0 = vector.load %arg2[%c0, %c0_0] : memref<16x128xbf16, #tpu.memory_space<vmem>>, vector<16x128xbf16>
    %c0_1 = arith.constant 0 : index
    %c0_2 = arith.constant 0 : index
    %1 = vector.load %arg3[%c0_1, %c0_2] : memref<128x128xbf16, #tpu.memory_space<vmem>>, vector<128x128xbf16>
    %cst = arith.constant dense<0.000000e+00> : vector<16x128xf32>
    %2 = tpu.matmul %0, %1, %cst {dimension_numbers = #tpu.dot_dimension_numbers<[1], [0], [0], [1], [0, 0, 1, 1], [], []>} : vector<16x128xbf16>, vector<128x128xbf16>, vector<16x128xf32> -> vector<16x128xf32>
    %c0_3 = arith.constant 0 : index
    %c0_4 = arith.constant 0 : index
    %3 = vector.load %arg4[%c0_3, %c0_4] : memref<1x128xf32, #tpu.memory_space<vmem>>, vector<1x128xf32>
    %4 = vector.broadcast %3 : vector<1x128xf32> to vector<16x128xf32>
    %5 = arith.addf %2, %4 : vector<16x128xf32>
    %cst_5 = arith.constant 0.000000e+00 : f32
    %6 = vector.broadcast %cst_5 : f32 to vector<16x128xf32>
    %7 = arith.maximumf %5, %6 : vector<16x128xf32>
    %c0_6 = arith.constant 0 : index
    %c0_7 = arith.constant 0 : index
    %8 = vector.load %arg5[%c0_6, %c0_7] : memref<16x128xf32, #tpu.memory_space<vmem>>, vector<16x128xf32>
    tpu.vector_store %arg5[%c0_6, %c0_7], %7 {strides = array<i32>} : memref<16x128xf32, #tpu.memory_space<vmem>>, vector<16x128xf32>,
    return
  }
  func.func @transform_0(%arg0: i32, %arg1: i32) -> (i32, i32) {
    %c0_i32 = arith.constant 0 : i32
    %c0_i32_0 = arith.constant 0 : i32
    return %arg0, %c0_i32 : i32, i32
  }
  func.func @transform_1(%arg0: i32, %arg1: i32) -> (i32, i32) {
    %c0_i32 = arith.constant 0 : i32
    %c0_i32_0 = arith.constant 0 : i32
    return %c0_i32, %arg1 : i32, i32
  }
  func.func @transform_2(%arg0: i32, %arg1: i32) -> (i32, i32) {
    %c0_i32 = arith.constant 0 : i32
    %c0_i32_0 = arith.constant 0 : i32
    return %c0_i32, %arg1 : i32, i32
  }
  func.func @transform_3(%arg0: i32, %arg1: i32) -> (i32, i32) {
    %c0_i32 = arith.constant 0 : i32
    return %arg0, %arg1 : i32, i32
  }
}

</mosaic_0001>

<bundles_post_ra>
// kernel: tpu_custom_call.1
= control target key start
LH: loop header
LB: loop body
LE: loop exit
PB: predicated region body
PF: predicated region fallthrough
CT: control target
= control target key end

     0   :  { %8 = vsyncpa [#allocation3], 0  ;;  %s383_s0 = inlined_call_operand.hbm [shape: bf16[16,128], index: 0, kind: input, shape index: {}]   ;;  %s384_s1 = inlined_call_operand.hbm [shape: bf16[128,128], index: 1, kind: input, shape index: {}]   ;;  %s385_s2 = inlined_call_operand.vmem [shape: f32[1,128], index: 2, kind: input, shape index: {}]   ;;  %s386_s3 = inlined_call_operand.hbm [shape: f32[16,128], index: 3, kind: output, shape index: {}]  }
   0x1   :  { %9 = vsyncpa [#allocation6], 0 }
   0x2   :  { %10 = vsyncpa [#allocation4], 0  ;;  %s315_s12 = smov [#allocation2]   ;;  %s243_s16 = scalar_lea.hbm %s383_s0, 128 }
   0x3   :  { %s16_s13 = sshll.u32 %s315_s12, 4  ;;  %p244_p0 = scmp.ne.s32.totalorder %s383_s0, %s243_s16  ;;  %s17_s13 = int_to_ptr.vmem [resolvable:$true] %s16_s13 }
   0x4   :  { %p247_p1 = scmp.lt.u32.totalorder %s243_s16, %s383_s0 }
   0x6   :  { %p249_p2 = pnand %p247_p1, %p244_p0 }
   0x8   :  { %252 = shalt.err (!%p249_p2)
}
   0x9   :  { %s253_s21 = scalar_lea.vmem %s17_s13, 128  ;;  %p258_p4 = scmp.lt.s32.totalorder %s17_s13, %s17_s13 }
   0xa   :  { %p254_p3 = scmp.ne.s32.totalorder %s17_s13, %s253_s21  ;;  %p259_p5 = scmp.lt.s32.totalorder %s253_s21, %s253_s21 }
   0xc   :  { %p260_p6 = por %p259_p5, %p258_p4 }
   0xe   :  { %p261_p7 = pnand %p260_p6, %p254_p3 }
  0x10   :  { %264 = shalt.err (!%p261_p7)
}
  0x11   :  { %s316_s22 = smov 64   ;;  %s317_s23 = smov 4  }
  0x12   :  { %22 = dma.hbm_to_vmem [thread:$0]  %s383_s0, 128, %s17_s13, [#allocation3], %s316_s22, %s316_s22, %s317_s23  }
  0x13   :  { %s318_s26 = smov [#allocation5]   ;;  %s265_s30 = scalar_lea.hbm %s384_s1, 1024 }
  0x14   :  { %s28_s27 = sshll.u32 %s318_s26, 4  ;;  %p266_p8 = scmp.ne.s32.totalorder %s384_s1, %s265_s30  ;;  %s29_s27 = int_to_ptr.vmem [resolvable:$true] %s28_s27 }
  0x15   :  { %p269_p9 = scmp.lt.u32.totalorder %s265_s30, %s384_s1 }
  0x17   :  { %p271_p10 = pnand %p269_p9, %p266_p8 }
  0x19   :  { %274 = shalt.err (!%p271_p10)
}
  0x1a   :  { %s275_s8 = scalar_lea.vmem %s29_s27, 1024  ;;  %p280_p12 = scmp.lt.s32.totalorder %s29_s27, %s29_s27 }
  0x1b   :  { %p276_p11 = scmp.ne.s32.totalorder %s29_s27, %s275_s8  ;;  %p281_p13 = scmp.lt.s32.totalorder %s275_s8, %s275_s8 }
  0x1d   :  { %p282_p0 = por %p281_p13, %p280_p12 }
  0x1f   :  { %p283_p1 = pnand %p282_p0, %p276_p11 }
  0x21   :  { %286 = shalt.err (!%p283_p1)
}
  0x22   :  { %34 = dma.hbm_to_vmem [thread:$0]  %s384_s1, 1024, %s29_s27, [#allocation6], %s316_s22, %s316_s22, %s317_s23  }
  0x23   :  { %309 = dma.done.wait [#allocation3], 128  }
  0x24   :  { %310 = vsyncadd [#allocation3], 4294967168 }
  0x25   :  { %311 = dma.done.wait [#allocation6], 1024  }
  0x26   :  { %312 = vsyncadd [#allocation6], 4294966272  ;;  %v319_v0 = vmov 0.0   ;;  %vm320_vm0 = vmmov 0   ;;  %v234_v1 = vld [vmem:[#allocation5] sm:$0xff]   ;;  %v235_v2 = vld [vmem:[#allocation5 + $0x8] sm:$0xff]  }
  0x27   :  { %205 = vmatprep.subr.bf16.mxu0 %v319_v0  ;;  %221 = vmatprep.mubr.msk.bf16.mxu0 %vm320_vm0, %v319_v0  ;;  %v236_v3 = vld [vmem:[#allocation5 + $0x10] sm:$0xff]   ;;  %v237_v4 = vld [vmem:[#allocation5 + $0x18] sm:$0xff]   ;;  %v238_v5 = vld [vmem:[#allocation5 + $0x20] sm:$0xff]   ;;  %s321_s11 = smov [#allocation7]  }
  0x28   :  { %206 = vmatpush3.bf16.msra.mxu0 %v234_v1  ;;  %v239_v6 = vld [vmem:[#allocation5 + $0x28] sm:$0xff]   ;;  %v240_v7 = vld [vmem:[#allocation5 + $0x30] sm:$0xff]   ;;  %v241_v8 = vld [vmem:[#allocation5 + $0x38] sm:$0xff]   ;;  %s173_s12 = sshll.u32 %s321_s11, 4  ;;  %s174_s12 = int_to_ptr.vmem [resolvable:$true] %s173_s12 }
  0x29   :  { %207 = vmatprep.subr.bf16.mxu0 %v319_v0  ;;  %v242_v9 = vld [vmem:[#allocation2] sm:$0xff]   ;;  %s287_s13 = scalar_lea.vmem %s174_s12, 256  ;;  %p292_p3 = scmp.lt.s32.totalorder %s174_s12, %s174_s12 }
  0x2a   :  { %v186_v10 = vld [vmem:[%s385_s2] ss:$0 sm:$0xff]  ;;  %p288_p2 = scmp.ne.s32.totalorder %s174_s12, %s287_s13  ;;  %p293_p4 = scmp.lt.s32.totalorder %s287_s13, %s287_s13 }
  0x2c   :  { %208 = vmatpush3.bf16.msra.mxu0 %v235_v2  ;;  %p294_p5 = por %p293_p4, %p292_p3 }
  0x2d   :  { %209 = vmatprep.subr.bf16.mxu0 %v319_v0 }
  0x2e   :  { %p295_p6 = pnand %p294_p5, %p288_p2 }
  0x30   :  { %210 = vmatpush3.bf16.msra.mxu0 %v236_v3 }
  0x31   :  { %211 = vmatprep.subr.bf16.mxu0 %v319_v0 }
  0x34   :  { %212 = vmatpush3.bf16.msra.mxu0 %v237_v4 }
  0x35   :  { %213 = vmatprep.subr.bf16.mxu0 %v319_v0 }
  0x38   :  { %214 = vmatpush3.bf16.msra.mxu0 %v238_v5 }
  0x39   :  { %215 = vmatprep.subr.bf16.mxu0 %v319_v0 }
  0x3c   :  { %216 = vmatpush3.bf16.msra.mxu0 %v239_v6 }
  0x3d   :  { %217 = vmatprep.subr.bf16.mxu0 %v319_v0 }
  0x40   :  { %218 = vmatpush3.bf16.msra.mxu0 %v240_v7 }
  0x41   :  { %219 = vmatprep.subr.bf16.mxu0 %v319_v0 }
  0x44   :  { %220 = vmatpush3.bf16.msra.mxu0 %v241_v8 }
  0x47   :  { %222 = vmatmul.mubr.bf16.vlgmr.msra.gmra.mrb[0].mxu0 %v242_v9 }
 0x11a   :  { %v157_v11 = vpop.f32.mrb[0].mxu0 }
 0x11b   :  { %v158_v12 = vadd.f32 %v186_v10, %v157_v11  ;;  %v223_v13 = vpop.f32.mrb[1].mxu0 }
 0x11c   :  { %v160_v14 = vpop.f32.mrb[2].mxu0 }
 0x11d   :  { %v164_v15 = vmax.f32 %v158_v12, 0.0  ;;  %v161_v16 = vadd.f32 %v186_v10, %v160_v14  ;;  %v224_v17 = vpop.f32.mrb[3].mxu0 }
 0x11f   :  { %166 = vst [vmem:[#allocation7] sm:$0xff] %v164_v15  ;;  %v165_v18 = vmax.f32 %v161_v16, 0.0 }
 0x121   :  { %167 = vst [vmem:[#allocation7 + $0x8] sm:$0xff] %v165_v18 }
 0x122   :  { %298 = shalt.err (!%p295_p6)
}
 0x123   :  { %s299_s15 = scalar_lea.hbm %s386_s3, 256 }
 0x124   :  { %p300_p7 = scmp.ne.s32.totalorder %s386_s3, %s299_s15  ;;  %p303_p8 = scmp.lt.u32.totalorder %s299_s15, %s386_s3 }
 0x126   :  { %p305_p9 = pnand %p303_p8, %p300_p7 }
 0x128   :  { %308 = shalt.err (!%p305_p9)
}
 0x129   :  { %s322_s20 = smov 128   ;;  %s323_s21 = smov 8  }
 0x12a   :  { %179 = dma.vmem_to_hbm [thread:$0]  %s174_s12, 256, %s386_s3, [#allocation4], %s322_s20, %s322_s20, %s323_s21  }
 0x12b   :  { %313 = dma.done.wait [#allocation4], 256  }
 0x12c   :  { %314 = vsyncadd [#allocation4], 4294967040 }
 0x12d   :  { %183 = vsyncpa [#allocation3], 1 }
 0x12e   :  { %184 = vsyncpa [#allocation6], 1 }
 0x12f   :  { %185 = vsyncpa [#allocation4], 1 }

</bundles_post_ra>
